<compile_context>
chip_gen: v7x
topology: tpu7x:2x2x1
jax: 0.10.0
libtpu: 0.0.40
codegen_flags: <defaults>
</compile_context>

<pallas_src>
import functools

import jax
import jax.numpy as jnp
import numpy as np
from jax.experimental import pallas as pl
from jax.experimental.pallas import tpu as pltpu


def _round_up(x, m):
    return (x + m - 1) // m * m


def _invariant_spec(shape, single_buffer):
    """BlockSpec for operands whose block index is constant across the grid."""
    index_map = lambda *_: (0,) * len(shape)
    if single_buffer:
        # No double-buffering for weights that never change block index.
        return pl.BlockSpec(shape, index_map, pipeline_mode=pl.Buffered(1))
    return pl.BlockSpec(shape, index_map)


# -------------------- tiled matmul + bias (input projection) --------------------
def _matmul_bias_kernel(x_ref, w_ref, b_ref, o_ref):
    o_ref[...] = (
        jnp.dot(x_ref[...], w_ref[...], preferred_element_type=jnp.float32)
        + b_ref[...]
    ).astype(o_ref.dtype)


def matmul_bias(x2d, w_t, b_row, *, out_dtype=jnp.float32, tile_n=512,
                single_buffer=True, vmem_limit_bytes=None):
    """(N, K) @ (K, M) + (1, M) -> (N, M), tiled over the N (row) axis.

    M is always a multiple of 128 here (gates padded to 4*Hp) so output stores
    are lane-dense.  For v7x (64 MiB VMEM) use a smaller tile_n (e.g. 256) or
    set vmem_limit_bytes explicitly; v5e/v6e (128 MiB) can go larger.
    """
    N, K = x2d.shape
    M = w_t.shape[1]
    if N <= tile_n:
        tn, Np = N, N
    else:
        tn = tile_n                    # multiple of 8 -> valid sublane tiling
        Np = _round_up(N, tn)
        if Np != N:
            x2d = jnp.pad(x2d, ((0, Np - N), (0, 0)))
    out = pl.pallas_call(
        _matmul_bias_kernel,
        out_shape=jax.ShapeDtypeStruct((Np, M), out_dtype),
        grid=(Np // tn,),
        in_specs=[
            pl.BlockSpec((tn, K), lambda i: (i, 0)),
            _invariant_spec((K, M), single_buffer),
            _invariant_spec((1, M), single_buffer),
        ],
        out_specs=pl.BlockSpec((tn, M), lambda i: (i, 0)),
        compiler_params=pltpu.CompilerParams(
            dimension_semantics=("parallel",),
            vmem_limit_bytes=vmem_limit_bytes),
    )(x2d, w_t, b_row)
    return out[:N] if Np != N else out


# ------------------------ chunked LSTM recurrence kernels ------------------------
def _lstm_step(t, carry, gx_ref, w_hh_ref, Hp):
    """One LSTM timestep; gx_ref already holds x_t @ W_ih^T + (b_ih + b_hh).

    All gate slices are 128-lane aligned (Hp is a multiple of 128).  Padded
    lanes of gates are exactly 0, so padded lanes of c stay 0 (0.5*c) and
    padded lanes of h stay 0 (0.5*tanh(0)).
    """
    h, c = carry
    gates = gx_ref[t].astype(jnp.float32) + jnp.dot(
        h.astype(w_hh_ref.dtype), w_hh_ref[...],
        preferred_element_type=jnp.float32)                       # (TB, 4*Hp)
    i_g = jax.nn.sigmoid(gates[:, 0 * Hp:1 * Hp])
    f_g = jax.nn.sigmoid(gates[:, 1 * Hp:2 * Hp])
    g_g = jnp.tanh(gates[:, 2 * Hp:3 * Hp])
    o_g = jax.nn.sigmoid(gates[:, 3 * Hp:4 * Hp])
    c = f_g * c + i_g * g_g
    h = o_g * jnp.tanh(c)
    return h, c


def _lstm_chunk_kernel(gx_ref, w_hh_ref, out_ref, h_scr, c_scr, *, unroll):
    """One grid step == TT timesteps of one batch tile.  h/c persist in VMEM
    scratch across time chunks; they are reset whenever the time index is 0
    (also correct when the leading batch-tile grid axis advances)."""
    @pl.when(pl.program_id(1) == 0)
    def _():
        h_scr[...] = jnp.zeros_like(h_scr)
        c_scr[...] = jnp.zeros_like(c_scr)

    Hp = h_scr.shape[-1]
    TT = gx_ref.shape[0]

    def body(t, carry):
        h, c = _lstm_step(t, carry, gx_ref, w_hh_ref, Hp)
        out_ref[t] = h.astype(out_ref.dtype)          # lane-dense (TB, Hp) store
        return h, c

    h, c = jax.lax.fori_loop(0, TT, body, (h_scr[...], c_scr[...]),
                             unroll=unroll)
    h_scr[...] = h
    c_scr[...] = c


def _lstm_chunk_fc_kernel(gx_ref, w_hh_ref, w_fc_ref, b_fc_ref, out_ref,
                          h_scr, c_scr, hbuf, *, unroll):
    """Last LSTM layer with the nn.Linear fused in.  The chunk's hidden states
    are buffered in VMEM and ONE (TT*TB, Hp)@(Hp, Op) matmul runs per grid
    step, off the serial recurrence chain (no tiny per-timestep FC matmuls)."""
    @pl.when(pl.program_id(1) == 0)
    def _():
        h_scr[...] = jnp.zeros_like(h_scr)
        c_scr[...] = jnp.zeros_like(c_scr)

    Hp = h_scr.shape[-1]
    TT, TB = gx_ref.shape[0], gx_ref.shape[1]

    def body(t, carry):
        h, c = _lstm_step(t, carry, gx_ref, w_hh_ref, Hp)
        hbuf[t] = h.astype(hbuf.dtype)
        return h, c

    h, c = jax.lax.fori_loop(0, TT, body, (h_scr[...], c_scr[...]),
                             unroll=unroll)
    h_scr[...] = h
    c_scr[...] = c

    # Chunk-batched fused FC: MXU-shape-efficient and off the critical path.
    hs = hbuf[...].reshape(TT * TB, Hp)
    y = (jnp.dot(hs, w_fc_ref[...], preferred_element_type=jnp.float32)
         + b_fc_ref[...])
    out_ref[...] = y.reshape(TT, TB, -1).astype(out_ref.dtype)


def lstm_chunked(gx_tbg, w_hh_t, Hp, *, time_chunk=16, unroll=None,
                 batch_tile=None, single_buffer=True, out_dtype=jnp.float32,
                 fc_w_t=None, fc_b_row=None, vmem_limit_bytes=None):
    """Run the LSTM recurrence over precomputed input gates gx (T, Bp, 4*Hp).

    If fc_w_t/fc_b_row are given the final Linear is fused and the result is
    (T, Bp, Op); otherwise the hidden sequence (T, Bp, Hp) is returned.

    Grid = (batch tiles ["parallel"], time chunks ["arbitrary"]): on v7x the
    batch-tile axis lets the second TensorCore take half the batch.
    """
    T, Bp, G = gx_tbg.shape
    assert G == 4 * Hp
    TT = min(time_chunk, T)
    Tp = _round_up(T, TT)
    if Tp != T:
        # Padded timesteps run with zero gx; their outputs are sliced off below.
        # TODO(synk): RNN1 never exposes (h_n, c_n); if it ever does, gate the
        # padded steps with pl.when so the final carried state stays exact.
        gx_tbg = jnp.pad(gx_tbg, ((0, Tp - T), (0, 0), (0, 0)))
    TB = Bp if batch_tile is None else min(batch_tile, Bp)
    assert Bp % TB == 0 and TB % 8 == 0
    if unroll is None:
        unroll = TT if TT <= 8 else 8      # bound vreg pressure at large H
    grid = (Bp // TB, Tp // TT)

    gx_spec = pl.BlockSpec((TT, TB, G), lambda b, c: (c, b, 0))
    whh_spec = _invariant_spec((Hp, G), single_buffer)
    scratch = [
        pltpu.VMEM((TB, Hp), jnp.float32),   # h state
        pltpu.VMEM((TB, Hp), jnp.float32),   # c state
    ]

    if fc_w_t is None:
        kernel = functools.partial(_lstm_chunk_kernel, unroll=unroll)
        in_specs = [gx_spec, whh_spec]
        operands = (gx_tbg, w_hh_t)
        out_dim = Hp
    else:
        Op = fc_w_t.shape[1]
        kernel = functools.partial(_lstm_chunk_fc_kernel, unroll=unroll)
        in_specs = [
            gx_spec, whh_spec,
            _invariant_spec((Hp, Op), single_buffer),
            _invariant_spec((1, Op), single_buffer),
        ]
        operands = (gx_tbg, w_hh_t, fc_w_t, fc_b_row)
        out_dim = Op
        scratch.append(pltpu.VMEM((TT, TB, Hp), fc_w_t.dtype))  # chunk h buffer

    out = pl.pallas_call(
        kernel,
        out_shape=jax.ShapeDtypeStruct((Tp, Bp, out_dim), out_dtype),
        grid_spec=pltpu.PrefetchScalarGridSpec(
            num_scalar_prefetch=0,
            grid=grid,
            in_specs=in_specs,
            out_specs=pl.BlockSpec((TT, TB, out_dim), lambda b, c: (c, b, 0)),
            scratch_shapes=scratch,
        ),
        compiler_params=pltpu.CompilerParams(
            # batch tiles independent; time recurrence strictly sequential.
            dimension_semantics=("parallel", "arbitrary"),
            vmem_limit_bytes=vmem_limit_bytes,
        ),
    )(*operands)
    return out[:T] if Tp != T else out


# ------------------------------- weight prepacking -------------------------------
def pack_params(params, *, matmul_dtype=jnp.float32):
    """Prepack (once, outside the forward) all weights into lane-aligned form.

    Each PyTorch gate [i, f, g, o] gets its own 128-aligned slab of the 4*Hp
    axis; W_hh rows, fc rows and biases are zero-padded so padded h/c lanes
    stay exactly zero through the recurrence.
    """
    H = params["lstm"][0]["w_hh"].shape[1]
    O = params["fc_w"].shape[0]
    Hp = _round_up(H, 128)
    Op = _round_up(O, 128)
    packed = {"H": H, "Hp": Hp, "O": O, "Op": Op, "layers": []}

    for li, layer in enumerate(params["lstm"]):
        w_ih = layer["w_ih"]                                   # (4H, D_in)
        w_hh = layer["w_hh"]                                   # (4H, H)
        b = (layer["b_ih"] + layer["b_hh"]).astype(jnp.float32)
        D_in = w_ih.shape[1]
        # For layers > 0 the input is the previous layer's padded hidden (Hp).
        Kp = Hp if li > 0 else D_in
        w_ih_t = jnp.transpose(w_ih).astype(matmul_dtype)      # (D_in, 4H)
        w_hh_t = jnp.transpose(w_hh).astype(matmul_dtype)      # (H, 4H)
        w_ih_p = jnp.zeros((Kp, 4 * Hp), matmul_dtype)
        w_hh_p = jnp.zeros((Hp, 4 * Hp), matmul_dtype)
        b_p = jnp.zeros((1, 4 * Hp), jnp.float32)
        for g in range(4):
            w_ih_p = w_ih_p.at[:D_in, g * Hp:g * Hp + H].set(
                w_ih_t[:, g * H:(g + 1) * H])
            w_hh_p = w_hh_p.at[:H, g * Hp:g * Hp + H].set(
                w_hh_t[:, g * H:(g + 1) * H])
            b_p = b_p.at[0, g * Hp:g * Hp + H].set(b[g * H:(g + 1) * H])
        packed["layers"].append(
            {"w_ih_t": w_ih_p, "w_hh_t": w_hh_p, "bias": b_p})

    fc_w_p = jnp.zeros((Hp, Op), matmul_dtype).at[:H, :O].set(
        jnp.transpose(params["fc_w"]).astype(matmul_dtype))
    fc_b_p = jnp.zeros((1, Op), jnp.float32).at[0, :O].set(
        params["fc_b"].astype(jnp.float32))
    packed["fc_w_t"] = fc_w_p
    packed["fc_b"] = fc_b_p
    return packed


# --------------------------------- RNN1 forward ---------------------------------
def rnn1_forward(x_btd, packed, *, matmul_dtype=jnp.float32, time_chunk=16,
                 unroll=None, batch_tile=None, single_buffer_weights=True,
                 tile_n=512, vmem_limit_bytes=None):
    """x_btd: (B, T, input_size) -> (B, T, output_size).  h0 = c0 = 0.

    `packed` comes from pack_params(params, matmul_dtype=...).  With
    matmul_dtype=bfloat16 the MXU operands AND the gx / inter-layer hidden
    streams are bf16 (half the HBM traffic); gate math, h/c and accumulation
    stay f32.  For v7x shrink tile_n / time_chunk or set vmem_limit_bytes
    (64 MiB physical VMEM); v5e/v6e (128 MiB) can go larger.
    """
    B, T, _ = x_btd.shape
    Hp, O, Op = packed["Hp"], packed["O"], packed["Op"]
    Bp = _round_up(B, 8)                     # sublane-dense batch
    act_dtype = matmul_dtype                 # activation stream dtype

    h = jnp.transpose(x_btd.astype(jnp.float32), (1, 0, 2))    # (T, B, D)
    if Bp != B:
        h = jnp.pad(h, ((0, 0), (0, Bp - B), (0, 0)))
    h = h.astype(matmul_dtype)

    num_layers = len(packed["layers"])
    for li, layer in enumerate(packed["layers"]):
        Kin = layer["w_ih_t"].shape[0]
        # Input projection hoisted out of the recurrence: one big row-tiled
        # MXU matmul over all T*Bp rows (no sequential dependency).
        gx = matmul_bias(
            h.reshape(T * Bp, Kin), layer["w_ih_t"], layer["bias"],
            out_dtype=act_dtype, tile_n=tile_n,
            single_buffer=single_buffer_weights,
            vmem_limit_bytes=vmem_limit_bytes,
        ).reshape(T, Bp, 4 * Hp)

        last = li == num_layers - 1
        h = lstm_chunked(
            gx, layer["w_hh_t"], Hp,
            time_chunk=time_chunk, unroll=unroll, batch_tile=batch_tile,
            single_buffer=single_buffer_weights,
            out_dtype=jnp.float32 if last else act_dtype,
            fc_w_t=packed["fc_w_t"] if last else None,
            fc_b_row=packed["fc_b"] if last else None,
            vmem_limit_bytes=vmem_limit_bytes,
        )

    out = h[:, :B, :O]                                          # (T, B, O)
    return jnp.transpose(out, (1, 0, 2))                        # (B, T, O)


# ------------------------------ Reference (pure JAX) -----------------------------
def rnn1_reference(x_btd, params):
    x = jnp.transpose(x_btd.astype(jnp.float32), (1, 0, 2))    # (T, B, D)
    for layer in params["lstm"]:
        w_ih, w_hh = layer["w_ih"], layer["w_hh"]
        b = layer["b_ih"] + layer["b_hh"]
        H = w_hh.shape[1]
        B = x.shape[1]

        def step(carry, x_t):
            h, c = carry
            g = x_t @ w_ih.T + h @ w_hh.T + b
            i = jax.nn.sigmoid(g[:, 0 * H:1 * H])
            f = jax.nn.sigmoid(g[:, 1 * H:2 * H])
            gg = jnp.tanh(g[:, 2 * H:3 * H])
            o = jax.nn.sigmoid(g[:, 3 * H:4 * H])
            c = f * c + i * gg
            h = o * jnp.tanh(c)
            return (h, c), h

        init = (jnp.zeros((B, H), jnp.float32), jnp.zeros((B, H), jnp.float32))
        _, x = jax.lax.scan(step, init, x)
    out = x @ params["fc_w"].T + params["fc_b"]
    return jnp.transpose(out, (1, 0, 2))


# ---------------------------------- Param init -----------------------------------
def init_params(key, input_size, hidden_size, num_layers, output_size):
    k = 1.0 / np.sqrt(hidden_size)
    params = {"lstm": []}
    for layer in range(num_layers):
        d_in = input_size if layer == 0 else hidden_size
        key, k1, k2, k3, k4 = jax.random.split(key, 5)
        params["lstm"].append({
            "w_ih": jax.random.uniform(k1, (4 * hidden_size, d_in), jnp.float32, -k, k),
            "w_hh": jax.random.uniform(k2, (4 * hidden_size, hidden_size), jnp.float32, -k, k),
            "b_ih": jax.random.uniform(k3, (4 * hidden_size,), jnp.float32, -k, k),
            "b_hh": jax.random.uniform(k4, (4 * hidden_size,), jnp.float32, -k, k),
        })
    key, k5, k6 = jax.random.split(key, 3)
    params["fc_w"] = jax.random.uniform(k5, (output_size, hidden_size), jnp.float32, -k, k)
    params["fc_b"] = jax.random.uniform(k6, (output_size,), jnp.float32, -k, k)
    return params


if __name__ == "__main__":
    B, T = 2, 8
    input_size, hidden_size, num_layers, output_size = 16, 32, 2, 8

    key = jax.random.PRNGKey(0)
    key, kx, kp = jax.random.split(key, 3)
    x = jax.random.normal(kx, (B, T, input_size), jnp.float32)
    params = init_params(kp, input_size, hidden_size, num_layers, output_size)

    ref = jax.block_until_ready(rnn1_reference(x, params))

    # f32 matmul path (matches the PyTorch reference numerics).
    packed_f32 = pack_params(params, matmul_dtype=jnp.float32)
    try:
        out = jax.block_until_ready(
            rnn1_forward(x, packed_f32, single_buffer_weights=True))
        single_buffer = True
    except Exception:
        # pl.Buffered(1) single-buffering unsupported on this JAX build:
        # fall back to default double-buffered weight specs.
        out = jax.block_until_ready(
            rnn1_forward(x, packed_f32, single_buffer_weights=False))
        single_buffer = False

    assert out.shape == (B, T, output_size), out.shape
    np.testing.assert_allclose(np.asarray(out), np.asarray(ref),
                               rtol=1e-5, atol=1e-5)

    # bf16 matmul + bf16 activation streams (recommended production dtype on
    # v5e/v6e/v7x); loose tolerance check.
    packed_bf16 = pack_params(params, matmul_dtype=jnp.bfloat16)
    out_bf16 = jax.block_until_ready(
        rnn1_forward(x, packed_bf16, matmul_dtype=jnp.bfloat16,
                     single_buffer_weights=single_buffer))
    assert out_bf16.shape == (B, T, output_size)
    assert float(jnp.max(jnp.abs(out_bf16.astype(jnp.float32) - ref))) < 0.1

    print("KERNEL_OK")
</pallas_src>

<mosaic_0001>
module attributes {stable_mosaic.version = 11 : i64} {
  func.func @_matmul_bias_kernel(%arg0: i32, %arg1: memref<64x16xf32, #tpu.memory_space<vmem>>, %arg2: memref<16x512xf32, #tpu.memory_space<vmem>>, %arg3: memref<1x512xf32, #tpu.memory_space<vmem>>, %arg4: memref<64x512xf32, #tpu.memory_space<vmem>>) attributes {dimension_semantics = [#tpu.dimension_semantics<parallel>], iteration_bounds = array<i64: 1>, scalar_prefetch = 0 : i64, scratch_operands = 0 : i64, tpu.core_type = #tpu.core_type<tc>, window_params = [{transform_indices = @transform_0, window_bounds = array<i64: 64, 16>}, {pipeline_mode = #tpu.pipeline_mode<synchronous>, transform_indices = @transform_1, window_bounds = array<i64: 16, 512>}, {pipeline_mode = #tpu.pipeline_mode<synchronous>, transform_indices = @transform_2, window_bounds = array<i64: 1, 512>}, {transform_indices = @transform_3, window_bounds = array<i64: 64, 512>}]} {
    %c0 = arith.constant 0 : index
    %c0_0 = arith.constant 0 : index
    %0 = vector.load %arg1[%c0, %c0_0] : memref<64x16xf32, #tpu.memory_space<vmem>>, vector<64x16xf32>
    %c0_1 = arith.constant 0 : index
    %c0_2 = arith.constant 0 : index
    %1 = vector.load %arg2[%c0_1, %c0_2] : memref<16x512xf32, #tpu.memory_space<vmem>>, vector<16x512xf32>
    %cst = arith.constant dense<0.000000e+00> : vector<64x512xf32>
    %2 = tpu.matmul %0, %1, %cst {dimension_numbers = #tpu.dot_dimension_numbers<[1], [0], [0], [1], [0, 0, 1, 1], [], []>} : vector<64x16xf32>, vector<16x512xf32>, vector<64x512xf32> -> vector<64x512xf32>
    %c0_3 = arith.constant 0 : index
    %c0_4 = arith.constant 0 : index
    %3 = vector.load %arg3[%c0_3, %c0_4] : memref<1x512xf32, #tpu.memory_space<vmem>>, vector<1x512xf32>
    %4 = vector.broadcast %3 : vector<1x512xf32> to vector<64x512xf32>
    %5 = arith.addf %2, %4 : vector<64x512xf32>
    %c0_5 = arith.constant 0 : index
    %c0_6 = arith.constant 0 : index
    %6 = vector.load %arg4[%c0_5, %c0_6] : memref<64x512xf32, #tpu.memory_space<vmem>>, vector<64x512xf32>
    tpu.vector_store %arg4[%c0_5, %c0_6], %5 {strides = array<i32>} : memref<64x512xf32, #tpu.memory_space<vmem>>, vector<64x512xf32>,
    return
  }
  func.func @transform_0(%arg0: i32) -> (i32, i32) {
    %c0_i32 = arith.constant 0 : i32
    %c0_i32_0 = arith.constant 0 : i32
    return %arg0, %c0_i32 : i32, i32
  }
  func.func @transform_1(%arg0: i32) -> (i32, i32) {
    %c0_i32 = arith.constant 0 : i32
    %c0_i32_0 = arith.constant 0 : i32
    %c0_i32_1 = arith.constant 0 : i32
    return %c0_i32, %c0_i32_0 : i32, i32
  }
  func.func @transform_2(%arg0: i32) -> (i32, i32) {
    %c0_i32 = arith.constant 0 : i32
    %c0_i32_0 = arith.constant 0 : i32
    %c0_i32_1 = arith.constant 0 : i32
    return %c0_i32, %c0_i32_0 : i32, i32
  }
  func.func @transform_3(%arg0: i32) -> (i32, i32) {
    %c0_i32 = arith.constant 0 : i32
    %c0_i32_0 = arith.constant 0 : i32
    return %arg0, %c0_i32 : i32, i32
  }
}

module attributes {stable_mosaic.version = 11 : i64} {
  func.func @_matmul_bias_kernel(%arg0: i32, %arg1: memref<64x16xf32, #tpu.memory_space<vmem>>, %arg2: memref<16x512xf32, #tpu.memory_space<vmem>>, %arg3: memref<1x512xf32, #tpu.memory_space<vmem>>, %arg4: memref<64x512xf32, #tpu.memory_space<vmem>>) attributes {dimension_semantics = [#tpu.dimension_semantics<parallel>], iteration_bounds = array<i64: 1>, scalar_prefetch = 0 : i64, scratch_operands = 0 : i64, tpu.core_type = #tpu.core_type<tc>, window_params = [{transform_indices = @transform_0, window_bounds = array<i64: 64, 16>}, {pipeline_mode = #tpu.pipeline_mode<synchronous>, transform_indices = @transform_1, window_bounds = array<i64: 16, 512>}, {pipeline_mode = #tpu.pipeline_mode<synchronous>, transform_indices = @transform_2, window_bounds = array<i64: 1, 512>}, {transform_indices = @transform_3, window_bounds = array<i64: 64, 512>}]} {
    %c0 = arith.constant 0 : index
    %c0_0 = arith.constant 0 : index
    %0 = vector.load %arg1[%c0, %c0_0] : memref<64x16xf32, #tpu.memory_space<vmem>>, vector<64x16xf32>
    %c0_1 = arith.constant 0 : index
    %c0_2 = arith.constant 0 : index
    %1 = vector.load %arg2[%c0_1, %c0_2] : memref<16x512xf32, #tpu.memory_space<vmem>>, vector<16x512xf32>
    %cst = arith.constant dense<0.000000e+00> : vector<64x512xf32>
    %2 = tpu.matmul %0, %1, %cst {dimension_numbers = #tpu.dot_dimension_numbers<[1], [0], [0], [1], [0, 0, 1, 1], [], []>} : vector<64x16xf32>, vector<16x512xf32>, vector<64x512xf32> -> vector<64x512xf32>
    %c0_3 = arith.constant 0 : index
    %c0_4 = arith.constant 0 : index
    %3 = vector.load %arg3[%c0_3, %c0_4] : memref<1x512xf32, #tpu.memory_space<vmem>>, vector<1x512xf32>
    %4 = vector.broadcast %3 : vector<1x512xf32> to vector<64x512xf32>
    %5 = arith.addf %2, %4 : vector<64x512xf32>
    %c0_5 = arith.constant 0 : index
    %c0_6 = arith.constant 0 : index
    %6 = vector.load %arg4[%c0_5, %c0_6] : memref<64x512xf32, #tpu.memory_space<vmem>>, vector<64x512xf32>
    tpu.vector_store %arg4[%c0_5, %c0_6], %5 {strides = array<i32>} : memref<64x512xf32, #tpu.memory_space<vmem>>, vector<64x512xf32>,
    return
  }
  func.func @transform_0(%arg0: i32) -> (i32, i32) {
    %c0_i32 = arith.constant 0 : i32
    %c0_i32_0 = arith.constant 0 : i32
    return %arg0, %c0_i32 : i32, i32
  }
  func.func @transform_1(%arg0: i32) -> (i32, i32) {
    %c0_i32 = arith.constant 0 : i32
    %c0_i32_0 = arith.constant 0 : i32
    %c0_i32_1 = arith.constant 0 : i32
    return %c0_i32, %c0_i32_0 : i32, i32
  }
  func.func @transform_2(%arg0: i32) -> (i32, i32) {
    %c0_i32 = arith.constant 0 : i32
    %c0_i32_0 = arith.constant 0 : i32
    %c0_i32_1 = arith.constant 0 : i32
    return %c0_i32, %c0_i32_0 : i32, i32
  }
  func.func @transform_3(%arg0: i32) -> (i32, i32) {
    %c0_i32 = arith.constant 0 : i32
    %c0_i32_0 = arith.constant 0 : i32
    return %arg0, %c0_i32 : i32, i32
  }
}

</mosaic_0001>

<bundles_post_ra>
// kernel: tpu_custom_call.1
= control target key start
LH: loop header
LB: loop body
LE: loop exit
PB: predicated region body
PF: predicated region fallthrough
CT: control target
= control target key end

     0   :  { %v404_v7 = vmov 0.0   ;;  %vm53_vm0 = vcmask 130048   ;;  %s547_s0 = inlined_call_operand.vmem [shape: f32[64,16], index: 0, kind: input, shape index: {}]   ;;  %s548_s1 = inlined_call_operand.vmem [shape: f32[16,512], index: 1, kind: input, shape index: {}]   ;;  %s549_s2 = inlined_call_operand.vmem [shape: f32[1,512], index: 2, kind: input, shape index: {}]   ;;  %s550_s3 = inlined_call_operand.hbm [shape: f32[64,512], index: 3, kind: output, shape index: {}]  }
   0x1   :  { %v24_v0 = vld [vmem:[%s548_s1 + $0x8] sm:$0xff]  ;;  %v26_v2 = vld [vmem:[%s548_s1 + $0x18] sm:$0xff]  ;;  %v23_v5 = vld [vmem:[%s548_s1] sm:$0xff]  ;;  %142 = vmatprep.mubr.f32.mxu0 %v404_v7  ;;  %255 = vmatprep.mubr.f32.mxu1 %v404_v7 }
   0x2   :  { %v28_v1 = vld [vmem:[%s548_s1 + $0x28] sm:$0xff]  ;;  %v30_v4 = vld [vmem:[%s548_s1 + $0x38] sm:$0xff]  ;;  %v27_v6 = vld [vmem:[%s548_s1 + $0x20] sm:$0xff] }
   0x3   :  { %v368_v3 = vpack.c.bf16 %v28_v1, %v24_v0  ;;  %v372_v8 = vpack.c.bf16 %v30_v4, %v26_v2  ;;  %v370_v9 = vpack.c.bf16 %v27_v6, %v23_v5  ;;  %v25_v10 = vld [vmem:[%s548_s1 + $0x10] sm:$0xff]  ;;  %v15_v13 = vld [vmem:[%s547_s0] sm:$0xff] }
   0x4   :  { %v29_v11 = vld [vmem:[%s548_s1 + $0x30] sm:$0xff] }
   0x5   :  { %369 = vmatprep.subr.bf16.mxu0 %v368_v3  ;;  %v374_v12 = vpack.c.bf16 %v29_v11, %v25_v10  ;;  %373 = vmatprep.subr.bf16.mxu1 %v372_v8 }
   0x6   :  { %371 = vmatpush1.bf16.msra.mxu0 %v370_v9 }
   0x7   :  { %375 = vmatpush1.bf16.msra.mxu1 %v374_v12 }
   0x8   :  { %8 = vsyncpa [#allocation3], 0  ;;  %v16_v14 = vld [vmem:[%s547_s0 + $0x8] sm:$0xff]  ;;  %v17_v15 = vld [vmem:[%s547_s0 + $0x10] sm:$0xff]  ;;  %v33_v21 = vlaneseq }
   0x9   :  { %352 = vmatmul.mubr.msk.f32.vlgmr.msra.gmra.mrb[0].mxu0 %vm53_vm0, %v15_v13  ;;  %v18_v16 = vld [vmem:[%s547_s0 + $0x18] sm:$0xff]  ;;  %v19_v17 = vld [vmem:[%s547_s0 + $0x20] sm:$0xff]  ;;  %v20_v18 = vld [vmem:[%s547_s0 + $0x28] sm:$0xff] }
   0xa   :  { %360 = vmatmul.mubr.msk.f32.vlgmr.msra.gmra.mrb[0].mxu1 %vm53_vm0, %v15_v13  ;;  %148 = vmatprep.mubr.f32.mxu0 %v404_v7  ;;  %v21_v19 = vld [vmem:[%s547_s0 + $0x30] sm:$0xff]  ;;  %v22_v20 = vld [vmem:[%s547_s0 + $0x38] sm:$0xff]  ;;  %v34_v22 = vshrl.u32 %v33_v21, 7  ;;  %v31_v24 = vld [vmem:[%s549_s2] sm:$0xf]  ;;  %s405_s0 = smov [#allocation2]  }
   0xb   :  { %261 = vmatprep.mubr.f32.mxu1 %v404_v7  ;;  %s341_s2 = sshll.u32 %s405_s0, 4  ;;  %s342_s2 = int_to_ptr.vmem [resolvable:$true] %s341_s2 }
   0xc   :  { %v35_v23 = vsub.s32 0, %v34_v22  ;;  %v43_v25 = vsub.s32 2, %v34_v22  ;;  %v39_v26 = vsub.s32 1, %v34_v22  ;;  %v47_v27 = vsub.s32 3, %v34_v22  ;;  %s380_s18 = scalar_lea.vmem %s342_s2, 4096  ;;  %p385_p1 = scmp.lt.s32.totalorder %s342_s2, %s342_s2 }
   0xd   :  { %353 = vmatmul.mubr.msk.f32.gmra.mrb[2].mxu0 %vm53_vm0, %v16_v14  ;;  %p381_p0 = scmp.ne.s32.totalorder %s342_s2, %s380_s18  ;;  %p386_p2 = scmp.lt.s32.totalorder %s380_s18, %s380_s18 }
   0xe   :  { %361 = vmatmul.mubr.msk.f32.gmra.mrb[2].mxu1 %vm53_vm0, %v16_v14  ;;  %154 = vmatprep.mubr.f32.mxu0 %v404_v7  ;;  %v495_v28 = vrot.slane %v31_v24, %v35_v23  ;;  %v497_v29 = vrot.slane %v31_v24, %v43_v25  ;;  %v499_v30 = vrot.slane %v31_v24, %v39_v26 }
   0xf   :  { %267 = vmatprep.mubr.f32.mxu1 %v404_v7  ;;  %v501_v31 = vrot.slane %v31_v24, %v47_v27  ;;  %p387_p3 = por %p386_p2, %p385_p1 }
  0x11   :  { %354 = vmatmul.mubr.msk.f32.gmra.mrb[4].mxu0 %vm53_vm0, %v17_v15  ;;  %p388_p4 = pnand %p387_p3, %p381_p0 }
  0x12   :  { %362 = vmatmul.mubr.msk.f32.gmra.mrb[4].mxu1 %vm53_vm0, %v17_v15  ;;  %160 = vmatprep.mubr.f32.mxu0 %v404_v7 }
  0x13   :  { %273 = vmatprep.mubr.f32.mxu1 %v404_v7 }
  0x15   :  { %355 = vmatmul.mubr.msk.f32.gmra.mrb[6].mxu0 %vm53_vm0, %v18_v16 }
  0x16   :  { %363 = vmatmul.mubr.msk.f32.gmra.mrb[6].mxu1 %vm53_vm0, %v18_v16  ;;  %166 = vmatprep.mubr.f32.mxu0 %v404_v7 }
  0x17   :  { %279 = vmatprep.mubr.f32.mxu1 %v404_v7 }
  0x19   :  { %356 = vmatmul.mubr.msk.f32.gmra.mrb[8].mxu0 %vm53_vm0, %v19_v17 }
  0x1a   :  { %364 = vmatmul.mubr.msk.f32.gmra.mrb[8].mxu1 %vm53_vm0, %v19_v17  ;;  %172 = vmatprep.mubr.f32.mxu0 %v404_v7 }
  0x1b   :  { %285 = vmatprep.mubr.f32.mxu1 %v404_v7 }
  0x1d   :  { %357 = vmatmul.mubr.msk.f32.gmra.mrb[10].mxu0 %vm53_vm0, %v20_v18 }
  0x1e   :  { %365 = vmatmul.mubr.msk.f32.gmra.mrb[10].mxu1 %vm53_vm0, %v20_v18  ;;  %178 = vmatprep.mubr.f32.mxu0 %v404_v7 }
  0x1f   :  { %291 = vmatprep.mubr.f32.mxu1 %v404_v7 }
  0x21   :  { %358 = vmatmul.mubr.msk.f32.gmra.mrb[12].mxu0 %vm53_vm0, %v21_v19 }
  0x22   :  { %366 = vmatmul.mubr.msk.f32.gmra.mrb[12].mxu1 %vm53_vm0, %v21_v19  ;;  %184 = vmatprep.mubr.f32.mxu0 %v404_v7 }
  0x23   :  { %297 = vmatprep.mubr.f32.mxu1 %v404_v7 }
  0x25   :  { %359 = vmatmul.mubr.msk.f32.gmra.mrb[14].mxu0 %vm53_vm0, %v22_v20 }
  0x26   :  { %367 = vmatmul.mubr.msk.f32.gmra.mrb[14].mxu1 %vm53_vm0, %v22_v20 }
  0xdc   :  { %v144_v32 = vpop.f32.mrb[0].mxu0 }
  0xdd   :  { %v145_v33 = vadd.f32 %v144_v32, %v495_v28  ;;  %v257_v34 = vpop.f32.mrb[0].mxu1  ;;  %v146_v35 = vpop.f32.mrb[1].mxu0 }
  0xde   :  { %v258_v36 = vadd.f32 %v257_v34, %v497_v29  ;;  %v147_v37 = vadd.f32 %v146_v35, %v499_v30  ;;  %v259_v38 = vpop.f32.mrb[1].mxu1 }
  0xdf   :  { %304 = vst [vmem:[#allocation2] sm:$0xff] %v145_v33  ;;  %v260_v39 = vadd.f32 %v259_v38, %v501_v31 }
  0xe0   :  { %306 = vst [vmem:[#allocation2 + $0x10] sm:$0xff] %v258_v36  ;;  %305 = vst [vmem:[#allocation2 + $0x8] sm:$0xff] %v147_v37  ;;  %v150_v40 = vpop.f32.mrb[2].mxu0 }
  0xe1   :  { %307 = vst [vmem:[#allocation2 + $0x18] sm:$0xff] %v260_v39  ;;  %v151_v41 = vadd.f32 %v150_v40, %v495_v28  ;;  %v263_v42 = vpop.f32.mrb[2].mxu1  ;;  %v152_v43 = vpop.f32.mrb[3].mxu0 }
  0xe2   :  { %v264_v44 = vadd.f32 %v263_v42, %v497_v29  ;;  %v153_v45 = vadd.f32 %v152_v43, %v499_v30  ;;  %v265_v46 = vpop.f32.mrb[3].mxu1 }
  0xe3   :  { %308 = vst [vmem:[#allocation2 + $0x20] sm:$0xff] %v151_v41  ;;  %v266_v47 = vadd.f32 %v265_v46, %v501_v31 }
  0xe4   :  { %310 = vst [vmem:[#allocation2 + $0x30] sm:$0xff] %v264_v44  ;;  %309 = vst [vmem:[#allocation2 + $0x28] sm:$0xff] %v153_v45  ;;  %v156_v48 = vpop.f32.mrb[4].mxu0 }
  0xe5   :  { %311 = vst [vmem:[#allocation2 + $0x38] sm:$0xff] %v266_v47  ;;  %v157_v49 = vadd.f32 %v156_v48, %v495_v28  ;;  %v269_v50 = vpop.f32.mrb[4].mxu1  ;;  %v158_v51 = vpop.f32.mrb[5].mxu0 }
  0xe6   :  { %v270_v52 = vadd.f32 %v269_v50, %v497_v29  ;;  %v159_v53 = vadd.f32 %v158_v51, %v499_v30  ;;  %v271_v54 = vpop.f32.mrb[5].mxu1 }
  0xe7   :  { %312 = vst [vmem:[#allocation2 + $0x40] sm:$0xff] %v157_v49  ;;  %v272_v55 = vadd.f32 %v271_v54, %v501_v31 }
  0xe8   :  { %314 = vst [vmem:[#allocation2 + $0x50] sm:$0xff] %v270_v52  ;;  %313 = vst [vmem:[#allocation2 + $0x48] sm:$0xff] %v159_v53  ;;  %v162_v56 = vpop.f32.mrb[6].mxu0 }
  0xe9   :  { %315 = vst [vmem:[#allocation2 + $0x58] sm:$0xff] %v272_v55  ;;  %v163_v57 = vadd.f32 %v162_v56, %v495_v28  ;;  %v275_v58 = vpop.f32.mrb[6].mxu1  ;;  %v164_v59 = vpop.f32.mrb[7].mxu0 }
  0xea   :  { %v276_v60 = vadd.f32 %v275_v58, %v497_v29  ;;  %v165_v61 = vadd.f32 %v164_v59, %v499_v30  ;;  %v277_v62 = vpop.f32.mrb[7].mxu1 }
  0xeb   :  { %316 = vst [vmem:[#allocation2 + $0x60] sm:$0xff] %v163_v57  ;;  %v278_v63 = vadd.f32 %v277_v62, %v501_v31 }
  0xec   :  { %318 = vst [vmem:[#allocation2 + $0x70] sm:$0xff] %v276_v60  ;;  %317 = vst [vmem:[#allocation2 + $0x68] sm:$0xff] %v165_v61  ;;  %v168_v0 = vpop.f32.mrb[8].mxu0 }
  0xed   :  { %319 = vst [vmem:[#allocation2 + $0x78] sm:$0xff] %v278_v63  ;;  %v169_v1 = vadd.f32 %v168_v0, %v495_v28  ;;  %v281_v2 = vpop.f32.mrb[8].mxu1  ;;  %v170_v3 = vpop.f32.mrb[9].mxu0 }
  0xee   :  { %v282_v4 = vadd.f32 %v281_v2, %v497_v29  ;;  %v171_v5 = vadd.f32 %v170_v3, %v499_v30  ;;  %v283_v6 = vpop.f32.mrb[9].mxu1 }
  0xef   :  { %320 = vst [vmem:[#allocation2 + $0x80] sm:$0xff] %v169_v1  ;;  %v284_v7 = vadd.f32 %v283_v6, %v501_v31 }
  0xf0   :  { %322 = vst [vmem:[#allocation2 + $0x90] sm:$0xff] %v282_v4  ;;  %321 = vst [vmem:[#allocation2 + $0x88] sm:$0xff] %v171_v5  ;;  %v174_v8 = vpop.f32.mrb[10].mxu0 }
  0xf1   :  { %323 = vst [vmem:[#allocation2 + $0x98] sm:$0xff] %v284_v7  ;;  %v175_v9 = vadd.f32 %v174_v8, %v495_v28  ;;  %v287_v10 = vpop.f32.mrb[10].mxu1  ;;  %v176_v11 = vpop.f32.mrb[11].mxu0 }
  0xf2   :  { %v288_v12 = vadd.f32 %v287_v10, %v497_v29  ;;  %v177_v13 = vadd.f32 %v176_v11, %v499_v30  ;;  %v289_v14 = vpop.f32.mrb[11].mxu1 }
  0xf3   :  { %324 = vst [vmem:[#allocation2 + $0xa0] sm:$0xff] %v175_v9  ;;  %v290_v15 = vadd.f32 %v289_v14, %v501_v31 }
  0xf4   :  { %326 = vst [vmem:[#allocation2 + $0xb0] sm:$0xff] %v288_v12  ;;  %325 = vst [vmem:[#allocation2 + $0xa8] sm:$0xff] %v177_v13  ;;  %v180_v16 = vpop.f32.mrb[12].mxu0 }
  0xf5   :  { %327 = vst [vmem:[#allocation2 + $0xb8] sm:$0xff] %v290_v15  ;;  %v181_v17 = vadd.f32 %v180_v16, %v495_v28  ;;  %v293_v18 = vpop.f32.mrb[12].mxu1  ;;  %v182_v19 = vpop.f32.mrb[13].mxu0 }
  0xf6   :  { %v294_v20 = vadd.f32 %v293_v18, %v497_v29  ;;  %v183_v21 = vadd.f32 %v182_v19, %v499_v30  ;;  %v295_v22 = vpop.f32.mrb[13].mxu1 }
  0xf7   :  { %328 = vst [vmem:[#allocation2 + $0xc0] sm:$0xff] %v181_v17  ;;  %v296_v23 = vadd.f32 %v295_v22, %v501_v31 }
  0xf8   :  { %330 = vst [vmem:[#allocation2 + $0xd0] sm:$0xff] %v294_v20  ;;  %329 = vst [vmem:[#allocation2 + $0xc8] sm:$0xff] %v183_v21  ;;  %v186_v24 = vpop.f32.mrb[14].mxu0 }
  0xf9   :  { %331 = vst [vmem:[#allocation2 + $0xd8] sm:$0xff] %v296_v23  ;;  %v187_v25 = vadd.f32 %v186_v24, %v495_v28  ;;  %v299_v26 = vpop.f32.mrb[14].mxu1  ;;  %v188_v27 = vpop.f32.mrb[15].mxu0 }
  0xfa   :  { %v300_v32 = vadd.f32 %v299_v26, %v497_v29  ;;  %v189_v33 = vadd.f32 %v188_v27, %v499_v30  ;;  %v301_v34 = vpop.f32.mrb[15].mxu1 }
  0xfb   :  { %332 = vst [vmem:[#allocation2 + $0xe0] sm:$0xff] %v187_v25  ;;  %v302_v35 = vadd.f32 %v301_v34, %v501_v31 }
  0xfc   :  { %334 = vst [vmem:[#allocation2 + $0xf0] sm:$0xff] %v300_v32  ;;  %333 = vst [vmem:[#allocation2 + $0xe8] sm:$0xff] %v189_v33 }
  0xfd   :  { %335 = vst [vmem:[#allocation2 + $0xf8] sm:$0xff] %v302_v35 }
  0xfe   :  { %391 = shalt.err (!%p388_p4)
}
  0xff   :  { %s392_s21 = scalar_lea.hbm %s550_s3, 4096 }
 0x100   :  { %p393_p5 = scmp.ne.s32.totalorder %s550_s3, %s392_s21  ;;  %p396_p6 = scmp.lt.u32.totalorder %s392_s21, %s550_s3 }
 0x102   :  { %p398_p7 = pnand %p396_p6, %p393_p5 }
 0x104   :  { %401 = shalt.err (!%p398_p7)
}
 0x105   :  { %s406_s26 = smov 512   ;;  %s407_s27 = smov 32  }
 0x106   :  { %347 = dma.vmem_to_hbm [thread:$0]  %s342_s2, 4096, %s550_s3, [#allocation3], %s406_s26, %s406_s26, %s407_s27  }
 0x107   :  { %402 = dma.done.wait [#allocation3], 4096  }
 0x108   :  { %403 = vsyncadd [#allocation3], 4294963200 }
 0x109   :  { %351 = vsyncpa [#allocation3], 1 }

// kernel: tpu_custom_call.1
= control target key start
LH: loop header
LB: loop body
LE: loop exit
PB: predicated region body
PF: predicated region fallthrough
CT: control target
= control target key end

     0   :  { %v404_v7 = vmov 0.0   ;;  %vm53_vm0 = vcmask 130048   ;;  %s547_s0 = inlined_call_operand.vmem [shape: f32[64,16], index: 0, kind: input, shape index: {}]   ;;  %s548_s1 = inlined_call_operand.vmem [shape: f32[16,512], index: 1, kind: input, shape index: {}]   ;;  %s549_s2 = inlined_call_operand.vmem [shape: f32[1,512], index: 2, kind: input, shape index: {}]   ;;  %s550_s3 = inlined_call_operand.hbm [shape: f32[64,512], index: 3, kind: output, shape index: {}]  }
   0x1   :  { %v24_v0 = vld [vmem:[%s548_s1 + $0x8] sm:$0xff]  ;;  %v26_v2 = vld [vmem:[%s548_s1 + $0x18] sm:$0xff]  ;;  %v23_v5 = vld [vmem:[%s548_s1] sm:$0xff]  ;;  %142 = vmatprep.mubr.f32.mxu0 %v404_v7  ;;  %255 = vmatprep.mubr.f32.mxu1 %v404_v7 }
   0x2   :  { %v28_v1 = vld [vmem:[%s548_s1 + $0x28] sm:$0xff]  ;;  %v30_v4 = vld [vmem:[%s548_s1 + $0x38] sm:$0xff]  ;;  %v27_v6 = vld [vmem:[%s548_s1 + $0x20] sm:$0xff] }
   0x3   :  { %v368_v3 = vpack.c.bf16 %v28_v1, %v24_v0  ;;  %v372_v8 = vpack.c.bf16 %v30_v4, %v26_v2  ;;  %v370_v9 = vpack.c.bf16 %v27_v6, %v23_v5  ;;  %v25_v10 = vld [vmem:[%s548_s1 + $0x10] sm:$0xff]  ;;  %v15_v13 = vld [vmem:[%s547_s0] sm:$0xff] }
   0x4   :  { %v29_v11 = vld [vmem:[%s548_s1 + $0x30] sm:$0xff] }
   0x5   :  { %369 = vmatprep.subr.bf16.mxu0 %v368_v3  ;;  %v374_v12 = vpack.c.bf16 %v29_v11, %v25_v10  ;;  %373 = vmatprep.subr.bf16.mxu1 %v372_v8 }
   0x6   :  { %371 = vmatpush1.bf16.msra.mxu0 %v370_v9 }
   0x7   :  { %375 = vmatpush1.bf16.msra.mxu1 %v374_v12 }
   0x8   :  { %8 = vsyncpa [#allocation3], 0  ;;  %v16_v14 = vld [vmem:[%s547_s0 + $0x8] sm:$0xff]  ;;  %v17_v15 = vld [vmem:[%s547_s0 + $0x10] sm:$0xff]  ;;  %v33_v21 = vlaneseq }
   0x9   :  { %352 = vmatmul.mubr.msk.f32.vlgmr.msra.gmra.mrb[0].mxu0 %vm53_vm0, %v15_v13  ;;  %v18_v16 = vld [vmem:[%s547_s0 + $0x18] sm:$0xff]  ;;  %v19_v17 = vld [vmem:[%s547_s0 + $0x20] sm:$0xff]  ;;  %v20_v18 = vld [vmem:[%s547_s0 + $0x28] sm:$0xff] }
   0xa   :  { %360 = vmatmul.mubr.msk.f32.vlgmr.msra.gmra.mrb[0].mxu1 %vm53_vm0, %v15_v13  ;;  %148 = vmatprep.mubr.f32.mxu0 %v404_v7  ;;  %v21_v19 = vld [vmem:[%s547_s0 + $0x30] sm:$0xff]  ;;  %v22_v20 = vld [vmem:[%s547_s0 + $0x38] sm:$0xff]  ;;  %v34_v22 = vshrl.u32 %v33_v21, 7  ;;  %v31_v24 = vld [vmem:[%s549_s2] sm:$0xf]  ;;  %s405_s0 = smov [#allocation2]  }
   0xb   :  { %261 = vmatprep.mubr.f32.mxu1 %v404_v7  ;;  %s341_s2 = sshll.u32 %s405_s0, 4  ;;  %s342_s2 = int_to_ptr.vmem [resolvable:$true] %s341_s2 }
   0xc   :  { %v35_v23 = vsub.s32 0, %v34_v22  ;;  %v43_v25 = vsub.s32 2, %v34_v22  ;;  %v39_v26 = vsub.s32 1, %v34_v22  ;;  %v47_v27 = vsub.s32 3, %v34_v22  ;;  %s380_s18 = scalar_lea.vmem %s342_s2, 4096  ;;  %p385_p1 = scmp.lt.s32.totalorder %s342_s2, %s342_s2 }
   0xd   :  { %353 = vmatmul.mubr.msk.f32.gmra.mrb[2].mxu0 %vm53_vm0, %v16_v14  ;;  %p381_p0 = scmp.ne.s32.totalorder %s342_s2, %s380_s18  ;;  %p386_p2 = scmp.lt.s32.totalorder %s380_s18, %s380_s18 }
   0xe   :  { %361 = vmatmul.mubr.msk.f32.gmra.mrb[2].mxu1 %vm53_vm0, %v16_v14  ;;  %154 = vmatprep.mubr.f32.mxu0 %v404_v7  ;;  %v495_v28 = vrot.slane %v31_v24, %v35_v23  ;;  %v497_v29 = vrot.slane %v31_v24, %v43_v25  ;;  %v499_v30 = vrot.slane %v31_v24, %v39_v26 }
   0xf   :  { %267 = vmatprep.mubr.f32.mxu1 %v404_v7  ;;  %v501_v31 = vrot.slane %v31_v24, %v47_v27  ;;  %p387_p3 = por %p386_p2, %p385_p1 }
  0x11   :  { %354 = vmatmul.mubr.msk.f32.gmra.mrb[4].mxu0 %vm53_vm0, %v17_v15  ;;  %p388_p4 = pnand %p387_p3, %p381_p0 }
  0x12   :  { %362 = vmatmul.mubr.msk.f32.gmra.mrb[4].mxu1 %vm53_vm0, %v17_v15  ;;  %160 = vmatprep.mubr.f32.mxu0 %v404_v7 }
  0x13   :  { %273 = vmatprep.mubr.f32.mxu1 %v404_v7 }
  0x15   :  { %355 = vmatmul.mubr.msk.f32.gmra.mrb[6].mxu0 %vm53_vm0, %v18_v16 }
  0x16   :  { %363 = vmatmul.mubr.msk.f32.gmra.mrb[6].mxu1 %vm53_vm0, %v18_v16  ;;  %166 = vmatprep.mubr.f32.mxu0 %v404_v7 }
  0x17   :  { %279 = vmatprep.mubr.f32.mxu1 %v404_v7 }
  0x19   :  { %356 = vmatmul.mubr.msk.f32.gmra.mrb[8].mxu0 %vm53_vm0, %v19_v17 }
  0x1a   :  { %364 = vmatmul.mubr.msk.f32.gmra.mrb[8].mxu1 %vm53_vm0, %v19_v17  ;;  %172 = vmatprep.mubr.f32.mxu0 %v404_v7 }
  0x1b   :  { %285 = vmatprep.mubr.f32.mxu1 %v404_v7 }
  0x1d   :  { %357 = vmatmul.mubr.msk.f32.gmra.mrb[10].mxu0 %vm53_vm0, %v20_v18 }
  0x1e   :  { %365 = vmatmul.mubr.msk.f32.gmra.mrb[10].mxu1 %vm53_vm0, %v20_v18  ;;  %178 = vmatprep.mubr.f32.mxu0 %v404_v7 }
  0x1f   :  { %291 = vmatprep.mubr.f32.mxu1 %v404_v7 }
  0x21   :  { %358 = vmatmul.mubr.msk.f32.gmra.mrb[12].mxu0 %vm53_vm0, %v21_v19 }
  0x22   :  { %366 = vmatmul.mubr.msk.f32.gmra.mrb[12].mxu1 %vm53_vm0, %v21_v19  ;;  %184 = vmatprep.mubr.f32.mxu0 %v404_v7 }
  0x23   :  { %297 = vmatprep.mubr.f32.mxu1 %v404_v7 }
  0x25   :  { %359 = vmatmul.mubr.msk.f32.gmra.mrb[14].mxu0 %vm53_vm0, %v22_v20 }
  0x26   :  { %367 = vmatmul.mubr.msk.f32.gmra.mrb[14].mxu1 %vm53_vm0, %v22_v20 }
  0xdc   :  { %v144_v32 = vpop.f32.mrb[0].mxu0 }
  0xdd   :  { %v145_v33 = vadd.f32 %v144_v32, %v495_v28  ;;  %v257_v34 = vpop.f32.mrb[0].mxu1  ;;  %v146_v35 = vpop.f32.mrb[1].mxu0 }
  0xde   :  { %v258_v36 = vadd.f32 %v257_v34, %v497_v29  ;;  %v147_v37 = vadd.f32 %v146_v35, %v499_v30  ;;  %v259_v38 = vpop.f32.mrb[1].mxu1 }
  0xdf   :  { %304 = vst [vmem:[#allocation2] sm:$0xff] %v145_v33  ;;  %v260_v39 = vadd.f32 %v259_v38, %v501_v31 }
  0xe0   :  { %306 = vst [vmem:[#allocation2 + $0x10] sm:$0xff] %v258_v36  ;;  %305 = vst [vmem:[#allocation2 + $0x8] sm:$0xff] %v147_v37  ;;  %v150_v40 = vpop.f32.mrb[2].mxu0 }
  0xe1   :  { %307 = vst [vmem:[#allocation2 + $0x18] sm:$0xff] %v260_v39  ;;  %v151_v41 = vadd.f32 %v150_v40, %v495_v28  ;;  %v263_v42 = vpop.f32.mrb[2].mxu1  ;;  %v152_v43 = vpop.f32.mrb[3].mxu0 }
  0xe2   :  { %v264_v44 = vadd.f32 %v263_v42, %v497_v29  ;;  %v153_v45 = vadd.f32 %v152_v43, %v499_v30  ;;  %v265_v46 = vpop.f32.mrb[3].mxu1 }
  0xe3   :  { %308 = vst [vmem:[#allocation2 + $0x20] sm:$0xff] %v151_v41  ;;  %v266_v47 = vadd.f32 %v265_v46, %v501_v31 }
  0xe4   :  { %310 = vst [vmem:[#allocation2 + $0x30] sm:$0xff] %v264_v44  ;;  %309 = vst [vmem:[#allocation2 + $0x28] sm:$0xff] %v153_v45  ;;  %v156_v48 = vpop.f32.mrb[4].mxu0 }
  0xe5   :  { %311 = vst [vmem:[#allocation2 + $0x38] sm:$0xff] %v266_v47  ;;  %v157_v49 = vadd.f32 %v156_v48, %v495_v28  ;;  %v269_v50 = vpop.f32.mrb[4].mxu1  ;;  %v158_v51 = vpop.f32.mrb[5].mxu0 }
  0xe6   :  { %v270_v52 = vadd.f32 %v269_v50, %v497_v29  ;;  %v159_v53 = vadd.f32 %v158_v51, %v499_v30  ;;  %v271_v54 = vpop.f32.mrb[5].mxu1 }
  0xe7   :  { %312 = vst [vmem:[#allocation2 + $0x40] sm:$0xff] %v157_v49  ;;  %v272_v55 = vadd.f32 %v271_v54, %v501_v31 }
  0xe8   :  { %314 = vst [vmem:[#allocation2 + $0x50] sm:$0xff] %v270_v52  ;;  %313 = vst [vmem:[#allocation2 + $0x48] sm:$0xff] %v159_v53  ;;  %v162_v56 = vpop.f32.mrb[6].mxu0 }
  0xe9   :  { %315 = vst [vmem:[#allocation2 + $0x58] sm:$0xff] %v272_v55  ;;  %v163_v57 = vadd.f32 %v162_v56, %v495_v28  ;;  %v275_v58 = vpop.f32.mrb[6].mxu1  ;;  %v164_v59 = vpop.f32.mrb[7].mxu0 }
  0xea   :  { %v276_v60 = vadd.f32 %v275_v58, %v497_v29  ;;  %v165_v61 = vadd.f32 %v164_v59, %v499_v30  ;;  %v277_v62 = vpop.f32.mrb[7].mxu1 }
  0xeb   :  { %316 = vst [vmem:[#allocation2 + $0x60] sm:$0xff] %v163_v57  ;;  %v278_v63 = vadd.f32 %v277_v62, %v501_v31 }
  0xec   :  { %318 = vst [vmem:[#allocation2 + $0x70] sm:$0xff] %v276_v60  ;;  %317 = vst [vmem:[#allocation2 + $0x68] sm:$0xff] %v165_v61  ;;  %v168_v0 = vpop.f32.mrb[8].mxu0 }
  0xed   :  { %319 = vst [vmem:[#allocation2 + $0x78] sm:$0xff] %v278_v63  ;;  %v169_v1 = vadd.f32 %v168_v0, %v495_v28  ;;  %v281_v2 = vpop.f32.mrb[8].mxu1  ;;  %v170_v3 = vpop.f32.mrb[9].mxu0 }
  0xee   :  { %v282_v4 = vadd.f32 %v281_v2, %v497_v29  ;;  %v171_v5 = vadd.f32 %v170_v3, %v499_v30  ;;  %v283_v6 = vpop.f32.mrb[9].mxu1 }
  0xef   :  { %320 = vst [vmem:[#allocation2 + $0x80] sm:$0xff] %v169_v1  ;;  %v284_v7 = vadd.f32 %v283_v6, %v501_v31 }
  0xf0   :  { %322 = vst [vmem:[#allocation2 + $0x90] sm:$0xff] %v282_v4  ;;  %321 = vst [vmem:[#allocation2 + $0x88] sm:$0xff] %v171_v5  ;;  %v174_v8 = vpop.f32.mrb[10].mxu0 }
  0xf1   :  { %323 = vst [vmem:[#allocation2 + $0x98] sm:$0xff] %v284_v7  ;;  %v175_v9 = vadd.f32 %v174_v8, %v495_v28  ;;  %v287_v10 = vpop.f32.mrb[10].mxu1  ;;  %v176_v11 = vpop.f32.mrb[11].mxu0 }
  0xf2   :  { %v288_v12 = vadd.f32 %v287_v10, %v497_v29  ;;  %v177_v13 = vadd.f32 %v176_v11, %v499_v30  ;;  %v289_v14 = vpop.f32.mrb[11].mxu1 }
  0xf3   :  { %324 = vst [vmem:[#allocation2 + $0xa0] sm:$0xff] %v175_v9  ;;  %v290_v15 = vadd.f32 %v289_v14, %v501_v31 }
  0xf4   :  { %326 = vst [vmem:[#allocation2 + $0xb0] sm:$0xff] %v288_v12  ;;  %325 = vst [vmem:[#allocation2 + $0xa8] sm:$0xff] %v177_v13  ;;  %v180_v16 = vpop.f32.mrb[12].mxu0 }
  0xf5   :  { %327 = vst [vmem:[#allocation2 + $0xb8] sm:$0xff] %v290_v15  ;;  %v181_v17 = vadd.f32 %v180_v16, %v495_v28  ;;  %v293_v18 = vpop.f32.mrb[12].mxu1  ;;  %v182_v19 = vpop.f32.mrb[13].mxu0 }
  0xf6   :  { %v294_v20 = vadd.f32 %v293_v18, %v497_v29  ;;  %v183_v21 = vadd.f32 %v182_v19, %v499_v30  ;;  %v295_v22 = vpop.f32.mrb[13].mxu1 }
  0xf7   :  { %328 = vst [vmem:[#allocation2 + $0xc0] sm:$0xff] %v181_v17  ;;  %v296_v23 = vadd.f32 %v295_v22, %v501_v31 }
  0xf8   :  { %330 = vst [vmem:[#allocation2 + $0xd0] sm:$0xff] %v294_v20  ;;  %329 = vst [vmem:[#allocation2 + $0xc8] sm:$0xff] %v183_v21  ;;  %v186_v24 = vpop.f32.mrb[14].mxu0 }
  0xf9   :  { %331 = vst [vmem:[#allocation2 + $0xd8] sm:$0xff] %v296_v23  ;;  %v187_v25 = vadd.f32 %v186_v24, %v495_v28  ;;  %v299_v26 = vpop.f32.mrb[14].mxu1  ;;  %v188_v27 = vpop.f32.mrb[15].mxu0 }
  0xfa   :  { %v300_v32 = vadd.f32 %v299_v26, %v497_v29  ;;  %v189_v33 = vadd.f32 %v188_v27, %v499_v30  ;;  %v301_v34 = vpop.f32.mrb[15].mxu1 }
  0xfb   :  { %332 = vst [vmem:[#allocation2 + $0xe0] sm:$0xff] %v187_v25  ;;  %v302_v35 = vadd.f32 %v301_v34, %v501_v31 }
  0xfc   :  { %334 = vst [vmem:[#allocation2 + $0xf0] sm:$0xff] %v300_v32  ;;  %333 = vst [vmem:[#allocation2 + $0xe8] sm:$0xff] %v189_v33 }
  0xfd   :  { %335 = vst [vmem:[#allocation2 + $0xf8] sm:$0xff] %v302_v35 }
  0xfe   :  { %391 = shalt.err (!%p388_p4)
}
  0xff   :  { %s392_s21 = scalar_lea.hbm %s550_s3, 4096 }
 0x100   :  { %p393_p5 = scmp.ne.s32.totalorder %s550_s3, %s392_s21  ;;  %p396_p6 = scmp.lt.u32.totalorder %s392_s21, %s550_s3 }
 0x102   :  { %p398_p7 = pnand %p396_p6, %p393_p5 }
 0x104   :  { %401 = shalt.err (!%p398_p7)
}
 0x105   :  { %s406_s26 = smov 512   ;;  %s407_s27 = smov 32  }
 0x106   :  { %347 = dma.vmem_to_hbm [thread:$0]  %s342_s2, 4096, %s550_s3, [#allocation3], %s406_s26, %s406_s26, %s407_s27  }
 0x107   :  { %402 = dma.done.wait [#allocation3], 4096  }
 0x108   :  { %403 = vsyncadd [#allocation3], 4294963200 }
 0x109   :  { %351 = vsyncpa [#allocation3], 1 }

</bundles_post_ra>
